<compile_context>
chip_gen: v6e
topology: v6e:2x2x1
jax: 0.10.0
libtpu: 0.0.40
codegen_flags: <defaults>
</compile_context>

<pallas_src>
import functools

import jax
import jax.numpy as jnp
from jax.experimental import pallas as pl
from jax.experimental.pallas import tpu as pltpu


_LANE = 128          # lane width: hidden dim padded to multiples of this
_SUBLANE = 8         # sublane width: batch tiles must be multiples of this
_EPS = 1e-12         # F.normalize default eps


def _round_up(x: int, m: int) -> int:
    return ((x + m - 1) // m) * m


def _vmem_limit(tile_m, d_in, hp, e, x_bytes, op_bytes, out_bytes, weight_bufs):
    """Explicit scoped-VMEM budget from the actual working set (+headroom)."""
    dl = _round_up(d_in, _LANE)
    el = _round_up(e, _LANE)
    x_buf = 2 * tile_m * dl * x_bytes                      # double-buffered x tiles
    o_buf = 2 * tile_m * el * out_bytes                    # double-buffered out tiles
    w_buf = weight_bufs * (dl * hp + hp * el) * op_bytes   # resident weights
    b_buf = weight_bufs * (hp + el) * 4                    # f32 biases
    live = tile_m * (hp + el) * 4                          # f32 h / e intermediates
    total = x_buf + o_buf + w_buf + b_buf + live
    # 2x headroom + 4 MiB slack for Mosaic internal scratch; clamp to a budget
    # that fits every generation's physical VMEM (64 MiB/TC on v7x).
    return int(min(max(2 * total + (4 << 20), 16 << 20), 64 << 20))


def tscl_encoder_kernel(x_ref, w1_ref, b1_ref, w2_ref, b2_ref, o_ref, *, op_dtype):
    """Fused MLP + L2-normalize for one (tile_m, *) batch tile.

    x_ref : (tile_m, D_in)  native input dtype (cast to op_dtype in-kernel)
    w1_ref: (D_in, Hp)      op_dtype
    b1_ref: (1, Hp)         f32
    w2_ref: (Hp, E)         op_dtype
    b2_ref: (1, E)          f32
    o_ref : (tile_m, E)     output dtype
    """
    # Single HBM read of x in its native dtype; MXU-operand cast is in-VMEM.
    x = x_ref[...].astype(op_dtype)

    # Layer 1: Linear + ReLU.  MXU with f32 accumulation; elementwise in f32.
    h = jnp.dot(x, w1_ref[...], preferred_element_type=jnp.float32)
    h = jnp.maximum(h + b1_ref[...], 0.0)

    # Layer 2: Linear (output layer, no activation).
    e = jnp.dot(h.astype(op_dtype), w2_ref[...], preferred_element_type=jnp.float32)
    e = e + b2_ref[...]                                    # (tile_m, E), f32

    # F.normalize(dim=1):  e / max(||e||, eps) == e * rsqrt(max(||e||^2, eps^2)).
    # rsqrt runs on the EUP slot (otherwise idle); reduction stays in f32 so
    # eps^2 = 1e-24 does not flush.
    sq = jnp.sum(e * e, axis=-1, keepdims=True)            # (tile_m, 1)
    inv = jax.lax.rsqrt(jnp.maximum(sq, _EPS * _EPS))
    o_ref[...] = (e * inv).astype(o_ref.dtype)


def tscl_encoder_forward(x, w1, b1, w2, b2, *, tile_m=None, mxu_dtype=None,
                         out_dtype=None, single_buffer_weights=True,
                         vmem_limit_bytes=None):
    """Forward pass of TSCL_Encoder_Network.

    x : (B, D_in); w1: (D_in, H); b1: (H,); w2: (H, E); b2: (E,)
    mxu_dtype : optional dtype for MXU operands (e.g. jnp.bfloat16); the cast of
                x happens inside the kernel, so x's HBM traffic stays native.
    out_dtype : optional output dtype for the normalized embedding (e.g. bf16).
    Returns (B, E).
    """
    B, D_in = x.shape
    H = w1.shape[1]
    E = w2.shape[1]
    out_dtype = x.dtype if out_dtype is None else out_dtype
    op_dtype = x.dtype if mxu_dtype is None else mxu_dtype

    # Hidden width padded to the 128-lane boundary: weight-sized, exact-zero
    # padding (padded h columns are relu(0)=0 and padded W2 rows are 0, so both
    # matmuls and the L2 norm are unchanged).  D_in and E are NOT padded: their
    # block dims equal the full array dims, so x is never copied in HBM and the
    # output needs no post-slice.
    Hp = _round_up(H, _LANE)

    w1_p = jnp.pad(w1, ((0, 0), (0, Hp - H))).astype(op_dtype)
    w2_p = jnp.pad(w2, ((0, Hp - H), (0, 0))).astype(op_dtype)
    b1_p = jnp.pad(b1, (0, Hp - H)).astype(jnp.float32).reshape(1, Hp)
    b2_p = b2.astype(jnp.float32).reshape(1, E)

    # Batch tiling: multiple of 8, >= 2 grid steps when possible (v7x megacore),
    # capped at 512 rows for DMA/compute overlap without blowing VMEM.
    if tile_m is None:
        tile_m = min(512, max(_SUBLANE, _round_up(pl.cdiv(B, 2), _SUBLANE)))
    tile_m = max(_SUBLANE, _round_up(tile_m, _SUBLANE))
    grid = (pl.cdiv(B, tile_m),)   # boundary block's output stores are masked

    if vmem_limit_bytes is None:
        vmem_limit_bytes = _vmem_limit(
            tile_m, D_in, Hp, E,
            jnp.dtype(x.dtype).itemsize,
            jnp.dtype(op_dtype).itemsize,
            jnp.dtype(out_dtype).itemsize,
            1 if single_buffer_weights else 2,
        )

    # Constant-index weight/bias blocks: fetch once, single-buffer if requested.
    resident = {"pipeline_mode": pl.Buffered(1)} if single_buffer_weights else {}

    kernel = functools.partial(tscl_encoder_kernel, op_dtype=op_dtype)

    out = pl.pallas_call(
        kernel,
        out_shape=jax.ShapeDtypeStruct((B, E), out_dtype),
        grid_spec=pltpu.PrefetchScalarGridSpec(
            num_scalar_prefetch=0,
            grid=grid,
            in_specs=[
                pl.BlockSpec((tile_m, D_in), lambda i: (i, 0)),          # x tile (pipelined)
                pl.BlockSpec((D_in, Hp), lambda i: (0, 0), **resident),  # W1 (resident)
                pl.BlockSpec((1, Hp), lambda i: (0, 0), **resident),     # b1
                pl.BlockSpec((Hp, E), lambda i: (0, 0), **resident),     # W2
                pl.BlockSpec((1, E), lambda i: (0, 0), **resident),      # b2
            ],
            out_specs=pl.BlockSpec((tile_m, E), lambda i: (i, 0)),
        ),
        compiler_params=pltpu.CompilerParams(
            dimension_semantics=("parallel",),     # megacore-shardable batch axis
            vmem_limit_bytes=vmem_limit_bytes,
        ),
    )(x, w1_p, b1_p, w2_p, b2_p)

    return out


def init_params(key, input_size, hidden_size, embedding_size, dtype=jnp.float32):
    """Deterministic synthetic init (PyTorch-Linear-like uniform ranges)."""
    k1, k2, k3, k4 = jax.random.split(key, 4)
    bound1 = 1.0 / jnp.sqrt(input_size)
    bound2 = 1.0 / jnp.sqrt(hidden_size)
    # Stored as (in, out) == transpose of torch's (out, in) weight.
    w1 = jax.random.uniform(k1, (input_size, hidden_size), dtype, -bound1, bound1)
    b1 = jax.random.uniform(k2, (hidden_size,), dtype, -bound1, bound1)
    w2 = jax.random.uniform(k3, (hidden_size, embedding_size), dtype, -bound2, bound2)
    b2 = jax.random.uniform(k4, (embedding_size,), dtype, -bound2, bound2)
    return w1, b1, w2, b2


def reference_forward(x, w1, b1, w2, b2):
    """Pure-JAX reference of the PyTorch forward (for sanity checking)."""
    h = jnp.maximum(x @ w1 + b1, 0.0)
    e = h @ w2 + b2
    denom = jnp.maximum(jnp.linalg.norm(e, axis=1, keepdims=True), _EPS)
    return e / denom


if __name__ == "__main__":
    # Small shapes consistent with the module:
    # input_size=16, hidden_sizes=[32], embedding_size=32, batch=8.
    B, D_IN, H, E = 8, 16, 32, 32

    key = jax.random.PRNGKey(0)
    k_params, k_x, k_x2 = jax.random.split(key, 3)
    w1, b1, w2, b2 = init_params(k_params, D_IN, H, E)
    x = jax.random.normal(k_x, (B, D_IN), jnp.float32)

    def run(xv, **kw):
        # Prefer single-buffered resident weights; fall back to default
        # double-buffering if this JAX build rejects pipeline_mode=Buffered(1)
        # on a top-level BlockSpec.
        try:
            fwd = jax.jit(functools.partial(
                tscl_encoder_forward, single_buffer_weights=True, **kw))
            return jax.block_until_ready(fwd(xv, w1, b1, w2, b2))
        except Exception:
            fwd = jax.jit(functools.partial(
                tscl_encoder_forward, single_buffer_weights=False, **kw))
            return jax.block_until_ready(fwd(xv, w1, b1, w2, b2))

    ref = reference_forward(x, w1, b1, w2, b2)

    # f32 MXU path: should match the reference tightly.
    out = run(x)
    assert out.shape == (B, E)
    assert jnp.allclose(out, ref, atol=2e-5, rtol=2e-5), "f32 mismatch vs reference"

    # bf16 MXU-operand path (in-kernel cast, f32 accumulate / elementwise).
    out_bf16 = run(x, mxu_dtype=jnp.bfloat16)
    assert out_bf16.shape == (B, E)
    assert jnp.allclose(out_bf16, ref, atol=3e-2, rtol=3e-2), "bf16 mismatch vs reference"

    # Ragged batch: exercises the cdiv grid + masked boundary output stores
    # (B=13, tile_m=8 -> 2 grid steps, last block half out of bounds).
    x2 = jax.random.normal(k_x2, (13, D_IN), jnp.float32)
    ref2 = reference_forward(x2, w1, b1, w2, b2)
    out2 = run(x2, tile_m=8)
    assert out2.shape == (13, E)
    assert jnp.allclose(out2, ref2, atol=2e-5, rtol=2e-5), "ragged-batch mismatch"

    print("KERNEL_OK")
</pallas_src>

<mosaic_0001>
module attributes {stable_mosaic.version = 11 : i64} {
  func.func @tscl_encoder_kernel(%arg0: i32, %arg1: memref<8x16xf32, #tpu.memory_space<vmem>>, %arg2: memref<16x128xf32, #tpu.memory_space<vmem>>, %arg3: memref<1x128xf32, #tpu.memory_space<vmem>>, %arg4: memref<128x32xf32, #tpu.memory_space<vmem>>, %arg5: memref<1x32xf32, #tpu.memory_space<vmem>>, %arg6: memref<8x32xf32, #tpu.memory_space<vmem>>) attributes {dimension_semantics = [#tpu.dimension_semantics<parallel>], iteration_bounds = array<i64: 1>, scalar_prefetch = 0 : i64, scratch_operands = 0 : i64, tpu.core_type = #tpu.core_type<tc>, window_params = [{transform_indices = @transform_0, window_bounds = array<i64: 8, 16>}, {pipeline_mode = #tpu.pipeline_mode<synchronous>, transform_indices = @transform_1, window_bounds = array<i64: 16, 128>}, {pipeline_mode = #tpu.pipeline_mode<synchronous>, transform_indices = @transform_2, window_bounds = array<i64: 1, 128>}, {pipeline_mode = #tpu.pipeline_mode<synchronous>, transform_indices = @transform_3, window_bounds = array<i64: 128, 32>}, {pipeline_mode = #tpu.pipeline_mode<synchronous>, transform_indices = @transform_4, window_bounds = array<i64: 1, 32>}, {transform_indices = @transform_5, window_bounds = array<i64: 8, 32>}]} {
    %c0 = arith.constant 0 : index
    %c0_0 = arith.constant 0 : index
    %0 = vector.load %arg1[%c0, %c0_0] : memref<8x16xf32, #tpu.memory_space<vmem>>, vector<8x16xf32>
    %c0_1 = arith.constant 0 : index
    %c0_2 = arith.constant 0 : index
    %1 = vector.load %arg2[%c0_1, %c0_2] : memref<16x128xf32, #tpu.memory_space<vmem>>, vector<16x128xf32>
    %cst = arith.constant dense<0.000000e+00> : vector<8x128xf32>
    %2 = tpu.matmul %0, %1, %cst {dimension_numbers = #tpu.dot_dimension_numbers<[1], [0], [0], [1], [0, 0, 1, 1], [], []>} : vector<8x16xf32>, vector<16x128xf32>, vector<8x128xf32> -> vector<8x128xf32>
    %c0_3 = arith.constant 0 : index
    %c0_4 = arith.constant 0 : index
    %3 = vector.load %arg3[%c0_3, %c0_4] : memref<1x128xf32, #tpu.memory_space<vmem>>, vector<1x128xf32>
    %4 = vector.broadcast %3 : vector<1x128xf32> to vector<8x128xf32>
    %5 = arith.addf %2, %4 : vector<8x128xf32>
    %cst_5 = arith.constant 0.000000e+00 : f32
    %6 = vector.broadcast %cst_5 : f32 to vector<8x128xf32>
    %7 = arith.maximumf %5, %6 : vector<8x128xf32>
    %c0_6 = arith.constant 0 : index
    %c0_7 = arith.constant 0 : index
    %8 = vector.load %arg4[%c0_6, %c0_7] : memref<128x32xf32, #tpu.memory_space<vmem>>, vector<128x32xf32>
    %cst_8 = arith.constant dense<0.000000e+00> : vector<8x32xf32>
    %9 = tpu.matmul %7, %8, %cst_8 {dimension_numbers = #tpu.dot_dimension_numbers<[1], [0], [0], [1], [0, 0, 1, 1], [], []>} : vector<8x128xf32>, vector<128x32xf32>, vector<8x32xf32> -> vector<8x32xf32>
    %c0_9 = arith.constant 0 : index
    %c0_10 = arith.constant 0 : index
    %10 = vector.load %arg5[%c0_9, %c0_10] : memref<1x32xf32, #tpu.memory_space<vmem>>, vector<1x32xf32>
    %11 = vector.broadcast %10 : vector<1x32xf32> to vector<8x32xf32>
    %12 = arith.addf %9, %11 : vector<8x32xf32>
    %13 = arith.mulf %12, %12 : vector<8x32xf32>
    %cst_11 = arith.constant dense<0.000000e+00> : vector<8xf32>
    %14 = vector.multi_reduction <add>, %13, %cst_11 [1] : vector<8x32xf32> to vector<8xf32>
    %15 = vector.shape_cast %14 : vector<8xf32> to vector<8x1xf32>
    %cst_12 = arith.constant 1.000000e-24 : f32
    %16 = vector.broadcast %cst_12 : f32 to vector<8x1xf32>
    %17 = arith.maximumf %15, %16 : vector<8x1xf32>
    %18 = math.rsqrt %17 : vector<8x1xf32>
    %19 = vector.broadcast %18 : vector<8x1xf32> to vector<8x32xf32>
    %20 = arith.mulf %12, %19 : vector<8x32xf32>
    %c0_13 = arith.constant 0 : index
    %c0_14 = arith.constant 0 : index
    %21 = vector.load %arg6[%c0_13, %c0_14] : memref<8x32xf32, #tpu.memory_space<vmem>>, vector<8x32xf32>
    tpu.vector_store %arg6[%c0_13, %c0_14], %20 {strides = array<i32>} : memref<8x32xf32, #tpu.memory_space<vmem>>, vector<8x32xf32>,
    return
  }
  func.func @transform_0(%arg0: i32) -> (i32, i32) {
    %c0_i32 = arith.constant 0 : i32
    %c0_i32_0 = arith.constant 0 : i32
    return %arg0, %c0_i32 : i32, i32
  }
  func.func @transform_1(%arg0: i32) -> (i32, i32) {
    %c0_i32 = arith.constant 0 : i32
    %c0_i32_0 = arith.constant 0 : i32
    %c0_i32_1 = arith.constant 0 : i32
    return %c0_i32, %c0_i32_0 : i32, i32
  }
  func.func @transform_2(%arg0: i32) -> (i32, i32) {
    %c0_i32 = arith.constant 0 : i32
    %c0_i32_0 = arith.constant 0 : i32
    %c0_i32_1 = arith.constant 0 : i32
    return %c0_i32, %c0_i32_0 : i32, i32
  }
  func.func @transform_3(%arg0: i32) -> (i32, i32) {
    %c0_i32 = arith.constant 0 : i32
    %c0_i32_0 = arith.constant 0 : i32
    %c0_i32_1 = arith.constant 0 : i32
    return %c0_i32, %c0_i32_0 : i32, i32
  }
  func.func @transform_4(%arg0: i32) -> (i32, i32) {
    %c0_i32 = arith.constant 0 : i32
    %c0_i32_0 = arith.constant 0 : i32
    %c0_i32_1 = arith.constant 0 : i32
    return %c0_i32, %c0_i32_0 : i32, i32
  }
  func.func @transform_5(%arg0: i32) -> (i32, i32) {
    %c0_i32 = arith.constant 0 : i32
    %c0_i32_0 = arith.constant 0 : i32
    return %arg0, %c0_i32 : i32, i32
  }
}

module attributes {stable_mosaic.version = 11 : i64} {
  func.func @tscl_encoder_kernel(%arg0: i32, %arg1: memref<8x16xf32, #tpu.memory_space<vmem>>, %arg2: memref<16x128xf32, #tpu.memory_space<vmem>>, %arg3: memref<1x128xf32, #tpu.memory_space<vmem>>, %arg4: memref<128x32xf32, #tpu.memory_space<vmem>>, %arg5: memref<1x32xf32, #tpu.memory_space<vmem>>, %arg6: memref<8x32xf32, #tpu.memory_space<vmem>>) attributes {dimension_semantics = [#tpu.dimension_semantics<parallel>], iteration_bounds = array<i64: 1>, scalar_prefetch = 0 : i64, scratch_operands = 0 : i64, tpu.core_type = #tpu.core_type<tc>, window_params = [{transform_indices = @transform_0, window_bounds = array<i64: 8, 16>}, {pipeline_mode = #tpu.pipeline_mode<synchronous>, transform_indices = @transform_1, window_bounds = array<i64: 16, 128>}, {pipeline_mode = #tpu.pipeline_mode<synchronous>, transform_indices = @transform_2, window_bounds = array<i64: 1, 128>}, {pipeline_mode = #tpu.pipeline_mode<synchronous>, transform_indices = @transform_3, window_bounds = array<i64: 128, 32>}, {pipeline_mode = #tpu.pipeline_mode<synchronous>, transform_indices = @transform_4, window_bounds = array<i64: 1, 32>}, {transform_indices = @transform_5, window_bounds = array<i64: 8, 32>}]} {
    %c0 = arith.constant 0 : index
    %c0_0 = arith.constant 0 : index
    %0 = vector.load %arg1[%c0, %c0_0] : memref<8x16xf32, #tpu.memory_space<vmem>>, vector<8x16xf32>
    %c0_1 = arith.constant 0 : index
    %c0_2 = arith.constant 0 : index
    %1 = vector.load %arg2[%c0_1, %c0_2] : memref<16x128xf32, #tpu.memory_space<vmem>>, vector<16x128xf32>
    %cst = arith.constant dense<0.000000e+00> : vector<8x128xf32>
    %2 = tpu.matmul %0, %1, %cst {dimension_numbers = #tpu.dot_dimension_numbers<[1], [0], [0], [1], [0, 0, 1, 1], [], []>} : vector<8x16xf32>, vector<16x128xf32>, vector<8x128xf32> -> vector<8x128xf32>
    %c0_3 = arith.constant 0 : index
    %c0_4 = arith.constant 0 : index
    %3 = vector.load %arg3[%c0_3, %c0_4] : memref<1x128xf32, #tpu.memory_space<vmem>>, vector<1x128xf32>
    %4 = vector.broadcast %3 : vector<1x128xf32> to vector<8x128xf32>
    %5 = arith.addf %2, %4 : vector<8x128xf32>
    %cst_5 = arith.constant 0.000000e+00 : f32
    %6 = vector.broadcast %cst_5 : f32 to vector<8x128xf32>
    %7 = arith.maximumf %5, %6 : vector<8x128xf32>
    %c0_6 = arith.constant 0 : index
    %c0_7 = arith.constant 0 : index
    %8 = vector.load %arg4[%c0_6, %c0_7] : memref<128x32xf32, #tpu.memory_space<vmem>>, vector<128x32xf32>
    %cst_8 = arith.constant dense<0.000000e+00> : vector<8x32xf32>
    %9 = tpu.matmul %7, %8, %cst_8 {dimension_numbers = #tpu.dot_dimension_numbers<[1], [0], [0], [1], [0, 0, 1, 1], [], []>} : vector<8x128xf32>, vector<128x32xf32>, vector<8x32xf32> -> vector<8x32xf32>
    %c0_9 = arith.constant 0 : index
    %c0_10 = arith.constant 0 : index
    %10 = vector.load %arg5[%c0_9, %c0_10] : memref<1x32xf32, #tpu.memory_space<vmem>>, vector<1x32xf32>
    %11 = vector.broadcast %10 : vector<1x32xf32> to vector<8x32xf32>
    %12 = arith.addf %9, %11 : vector<8x32xf32>
    %13 = arith.mulf %12, %12 : vector<8x32xf32>
    %cst_11 = arith.constant dense<0.000000e+00> : vector<8xf32>
    %14 = vector.multi_reduction <add>, %13, %cst_11 [1] : vector<8x32xf32> to vector<8xf32>
    %15 = vector.shape_cast %14 : vector<8xf32> to vector<8x1xf32>
    %cst_12 = arith.constant 1.000000e-24 : f32
    %16 = vector.broadcast %cst_12 : f32 to vector<8x1xf32>
    %17 = arith.maximumf %15, %16 : vector<8x1xf32>
    %18 = math.rsqrt %17 : vector<8x1xf32>
    %19 = vector.broadcast %18 : vector<8x1xf32> to vector<8x32xf32>
    %20 = arith.mulf %12, %19 : vector<8x32xf32>
    %c0_13 = arith.constant 0 : index
    %c0_14 = arith.constant 0 : index
    %21 = vector.load %arg6[%c0_13, %c0_14] : memref<8x32xf32, #tpu.memory_space<vmem>>, vector<8x32xf32>
    tpu.vector_store %arg6[%c0_13, %c0_14], %20 {strides = array<i32>} : memref<8x32xf32, #tpu.memory_space<vmem>>, vector<8x32xf32>,
    return
  }
  func.func @transform_0(%arg0: i32) -> (i32, i32) {
    %c0_i32 = arith.constant 0 : i32
    %c0_i32_0 = arith.constant 0 : i32
    return %arg0, %c0_i32 : i32, i32
  }
  func.func @transform_1(%arg0: i32) -> (i32, i32) {
    %c0_i32 = arith.constant 0 : i32
    %c0_i32_0 = arith.constant 0 : i32
    %c0_i32_1 = arith.constant 0 : i32
    return %c0_i32, %c0_i32_0 : i32, i32
  }
  func.func @transform_2(%arg0: i32) -> (i32, i32) {
    %c0_i32 = arith.constant 0 : i32
    %c0_i32_0 = arith.constant 0 : i32
    %c0_i32_1 = arith.constant 0 : i32
    return %c0_i32, %c0_i32_0 : i32, i32
  }
  func.func @transform_3(%arg0: i32) -> (i32, i32) {
    %c0_i32 = arith.constant 0 : i32
    %c0_i32_0 = arith.constant 0 : i32
    %c0_i32_1 = arith.constant 0 : i32
    return %c0_i32, %c0_i32_0 : i32, i32
  }
  func.func @transform_4(%arg0: i32) -> (i32, i32) {
    %c0_i32 = arith.constant 0 : i32
    %c0_i32_0 = arith.constant 0 : i32
    %c0_i32_1 = arith.constant 0 : i32
    return %c0_i32, %c0_i32_0 : i32, i32
  }
  func.func @transform_5(%arg0: i32) -> (i32, i32) {
    %c0_i32 = arith.constant 0 : i32
    %c0_i32_0 = arith.constant 0 : i32
    return %arg0, %c0_i32 : i32, i32
  }
}

</mosaic_0001>

<bundles_post_ra>
// kernel: tscl_encoder_forward.1
= control target key start
LH: loop header
LB: loop body
LE: loop exit
PB: predicated region body
PF: predicated region fallthrough
CT: control target
= control target key end

     0   :  { %v314_v1 = vmov 0.0   ;;  %vm315_vm0 = vmmov 0   ;;  %vm31_vm1 = vcmask 130048   ;;  %s415_s0 = inlined_call_operand.vmem [shape: f32[8,16], index: 0, kind: input, shape index: {}]   ;;  %s416_s1 = inlined_call_operand.vmem [shape: f32[16,128], index: 1, kind: input, shape index: {}]   ;;  %s417_s2 = inlined_call_operand.vmem [shape: f32[1,128], index: 2, kind: input, shape index: {}]   ;;  %s418_s3 = inlined_call_operand.vmem [shape: f32[128,32], index: 3, kind: input, shape index: {}]   ;;  %s419_s4 = inlined_call_operand.vmem [shape: f32[1,32], index: 4, kind: input, shape index: {}]   ;;  %s420_s5 = inlined_call_operand.hbm [shape: f32[8,32], index: 5, kind: output, shape index: {}]  }
   0x1   :  { %v23_v0 = vld [vmem:[%s416_s1 + $0x8] sm:$0xff]  ;;  %245 = vmatprep.subr.mxu0 %v314_v1  ;;  %v22_v2 = vld [vmem:[%s416_s1] sm:$0xff]  ;;  %249 = vmatprep.mubr.msk.f32.mxu0 %vm315_vm0, %v314_v1  ;;  %v121_v3 = vld [vmem:[%s418_s3 + $0x78] sm:$0xff] }
   0x2   :  { %246 = vmatpush3.msra.mxu0 %v23_v0  ;;  %v21_v4 = vld [vmem:[%s415_s0] sm:$0xff]  ;;  %252 = vmatprep.subr.mxu1 %v314_v1  ;;  %v120_v5 = vld [vmem:[%s418_s3 + $0x70] sm:$0xff]  ;;  %v119_v6 = vld [vmem:[%s418_s3 + $0x68] sm:$0xff] }
   0x3   :  { %247 = vmatprep.subr.mxu0 %v314_v1  ;;  %253 = vmatpush3.msra.mxu1 %v121_v3 }
   0x4   :  { %248 = vmatpush3.msra.mxu0 %v22_v2  ;;  %254 = vmatprep.subr.mxu1 %v314_v1 }
   0x5   :  { %250 = vmatmul.mubr.msk.f32.vlgmr.msra.gmra.mxu0 %vm31_vm1, %v21_v4  ;;  %255 = vmatpush3.msra.mxu1 %v120_v5 }
   0x6   :  { %10 = vsyncpa [#allocation3], 0  ;;  %256 = vmatprep.subr.mxu1 %v314_v1  ;;  %v118_v7 = vld [vmem:[%s418_s3 + $0x60] sm:$0xff]  ;;  %284 = vmatprep.mubr.msk.f32.mxu1 %vm315_vm0, %v314_v1  ;;  %v117_v8 = vld [vmem:[%s418_s3 + $0x58] sm:$0xff]  ;;  %vm200_vm2 = vcmask 261120  }
   0x7   :  { %257 = vmatpush3.msra.mxu1 %v119_v6  ;;  %v116_v9 = vld [vmem:[%s418_s3 + $0x50] sm:$0xff]  ;;  %v115_v10 = vld [vmem:[%s418_s3 + $0x48] sm:$0xff]  ;;  %v114_v11 = vld [vmem:[%s418_s3 + $0x40] sm:$0xff] }
   0x8   :  { %258 = vmatprep.subr.mxu1 %v314_v1  ;;  %v113_v12 = vld [vmem:[%s418_s3 + $0x38] sm:$0xff]  ;;  %v112_v13 = vld [vmem:[%s418_s3 + $0x30] sm:$0xff]  ;;  %v111_v14 = vld [vmem:[%s418_s3 + $0x28] sm:$0xff] }
   0x9   :  { %259 = vmatpush3.msra.mxu1 %v118_v7  ;;  %v110_v15 = vld [vmem:[%s418_s3 + $0x20] sm:$0xff]  ;;  %v109_v16 = vld [vmem:[%s418_s3 + $0x18] sm:$0xff]  ;;  %v108_v17 = vld [vmem:[%s418_s3 + $0x10] sm:$0xff] }
   0xa   :  { %260 = vmatprep.subr.mxu1 %v314_v1  ;;  %v107_v18 = vld [vmem:[%s418_s3 + $0x8] sm:$0xff]  ;;  %v106_v19 = vld [vmem:[%s418_s3] sm:$0xff] }
   0xb   :  { %261 = vmatpush3.msra.mxu1 %v117_v8  ;;  %v222_v20 = vld [vmem:[%s417_s2] ss:$0 sm:$0xff]  ;;  %s316_s2 = smov [#allocation2]  }
   0xc   :  { %262 = vmatprep.subr.mxu1 %v314_v1  ;;  %v224_v25 = vld [vmem:[%s419_s4] ss:$0 sm:$0xff]  ;;  %s214_s3 = sshll.u32 %s316_s2, 4  ;;  %s215_s3 = int_to_ptr.vmem [resolvable:$true] %s214_s3 }
   0xd   :  { %263 = vmatpush3.msra.mxu1 %v116_v9  ;;  %s292_s6 = scalar_lea.vmem %s215_s3, 128  ;;  %p297_p1 = scmp.lt.s32.totalorder %s215_s3, %s215_s3 }
   0xe   :  { %264 = vmatprep.subr.mxu1 %v314_v1  ;;  %p293_p0 = scmp.ne.s32.totalorder %s215_s3, %s292_s6  ;;  %p298_p2 = scmp.lt.s32.totalorder %s292_s6, %s292_s6 }
   0xf   :  { %265 = vmatpush3.msra.mxu1 %v115_v10 }
  0x10   :  { %266 = vmatprep.subr.mxu1 %v314_v1  ;;  %p299_p3 = por %p298_p2, %p297_p1 }
  0x11   :  { %267 = vmatpush3.msra.mxu1 %v114_v11 }
  0x12   :  { %268 = vmatprep.subr.mxu1 %v314_v1  ;;  %p300_p4 = pnand %p299_p3, %p293_p0 }
  0x13   :  { %269 = vmatpush3.msra.mxu1 %v113_v12 }
  0x14   :  { %270 = vmatprep.subr.mxu1 %v314_v1 }
  0x15   :  { %271 = vmatpush3.msra.mxu1 %v112_v13 }
  0x16   :  { %272 = vmatprep.subr.mxu1 %v314_v1 }
  0x17   :  { %273 = vmatpush3.msra.mxu1 %v111_v14 }
  0x18   :  { %274 = vmatprep.subr.mxu1 %v314_v1 }
  0x19   :  { %275 = vmatpush3.msra.mxu1 %v110_v15 }
  0x1a   :  { %276 = vmatprep.subr.mxu1 %v314_v1 }
  0x1b   :  { %277 = vmatpush3.msra.mxu1 %v109_v16 }
  0x1c   :  { %278 = vmatprep.subr.mxu1 %v314_v1 }
  0x1d   :  { %279 = vmatpush3.msra.mxu1 %v108_v17 }
  0x1e   :  { %280 = vmatprep.subr.mxu1 %v314_v1 }
  0x1f   :  { %281 = vmatpush3.msra.mxu1 %v107_v18 }
  0x20   :  { %282 = vmatprep.subr.mxu1 %v314_v1 }
  0x21   :  { %283 = vmatpush3.msra.mxu1 %v106_v19 }
  0xc5   :  { %v101_v21 = vpop.f32.mrf.mxu0 }
  0xc6   :  { %v102_v22 = vadd.f32 %v222_v20, %v101_v21 }
  0xc7   :  { %v251_v23 = vpop.f32.mrf.mxu0 }
  0xc8   :  { %v105_v24 = vmax.f32 %v102_v22, 0.0 }
  0xca   :  { %285 = vmatmul.mubr.f32.vlgmr.msra.gmra.mxu1 %v105_v24 }
 0x18a   :  { %v195_v26 = vpop.f32.mrf.mxu1 }
 0x18b   :  { %v196_v27 = vadd.f32 %v224_v25, %v195_v26 }
 0x18c   :  { %v286_v28 = vpop.f32.mrf.mxu1 }
 0x18d   :  { %v199_v29 = vmul.f32 %v196_v27, %v196_v27 }
 0x18f   :  { %v201_v30 = vsel %vm200_vm2, %v199_v29, 0.0 }
 0x190   :  { %202 = vadd.xlane.f32.xlu0 %v201_v30 }
 0x219   :  { %v203_v31 = vpop.xlane.xlu0 %202 }
 0x21a   :  { %v204_v32 = vmax.f32 %v203_v31, 1e-24 }
 0x21c   :  { %290 = vrsqrt.f32 %v204_v32 }
 0x229   :  { %v291_v33 = vpop.eup %290 }
 0x22a   :  { %v206_v34 = vmul.f32 %v291_v33, %v196_v27 }
 0x22c   :  { %207 = vst.msk [vmem:[#allocation2] sm:$0xff] %vm200_vm2, %v206_v34 }
 0x22d   :  { %303 = shalt.err (!%p300_p4)
}
 0x22e   :  { %217 = dma.vmem_to_hbm [thread:$0]  %s215_s3, 128, %s420_s5, [#allocation3]  }
 0x22f   :  { %312 = dma.done.wait [#allocation3], 128  }
 0x230   :  { %313 = vsyncadd [#allocation3], 4294967168 }
 0x231   :  { %221 = vsyncpa [#allocation3], 1 }

// kernel: tscl_encoder_forward.1
= control target key start
LH: loop header
LB: loop body
LE: loop exit
PB: predicated region body
PF: predicated region fallthrough
CT: control target
= control target key end

     0   :  { %v314_v1 = vmov 0.0   ;;  %vm315_vm0 = vmmov 0   ;;  %vm31_vm1 = vcmask 130048   ;;  %s415_s0 = inlined_call_operand.vmem [shape: f32[8,16], index: 0, kind: input, shape index: {}]   ;;  %s416_s1 = inlined_call_operand.vmem [shape: f32[16,128], index: 1, kind: input, shape index: {}]   ;;  %s417_s2 = inlined_call_operand.vmem [shape: f32[1,128], index: 2, kind: input, shape index: {}]   ;;  %s418_s3 = inlined_call_operand.vmem [shape: f32[128,32], index: 3, kind: input, shape index: {}]   ;;  %s419_s4 = inlined_call_operand.vmem [shape: f32[1,32], index: 4, kind: input, shape index: {}]   ;;  %s420_s5 = inlined_call_operand.hbm [shape: f32[8,32], index: 5, kind: output, shape index: {}]  }
   0x1   :  { %v23_v0 = vld [vmem:[%s416_s1 + $0x8] sm:$0xff]  ;;  %245 = vmatprep.subr.mxu0 %v314_v1  ;;  %v22_v2 = vld [vmem:[%s416_s1] sm:$0xff]  ;;  %249 = vmatprep.mubr.msk.f32.mxu0 %vm315_vm0, %v314_v1  ;;  %v121_v3 = vld [vmem:[%s418_s3 + $0x78] sm:$0xff] }
   0x2   :  { %246 = vmatpush3.msra.mxu0 %v23_v0  ;;  %v21_v4 = vld [vmem:[%s415_s0] sm:$0xff]  ;;  %252 = vmatprep.subr.mxu1 %v314_v1  ;;  %v120_v5 = vld [vmem:[%s418_s3 + $0x70] sm:$0xff]  ;;  %v119_v6 = vld [vmem:[%s418_s3 + $0x68] sm:$0xff] }
   0x3   :  { %247 = vmatprep.subr.mxu0 %v314_v1  ;;  %253 = vmatpush3.msra.mxu1 %v121_v3 }
   0x4   :  { %248 = vmatpush3.msra.mxu0 %v22_v2  ;;  %254 = vmatprep.subr.mxu1 %v314_v1 }
   0x5   :  { %250 = vmatmul.mubr.msk.f32.vlgmr.msra.gmra.mxu0 %vm31_vm1, %v21_v4  ;;  %255 = vmatpush3.msra.mxu1 %v120_v5 }
   0x6   :  { %10 = vsyncpa [#allocation3], 0  ;;  %256 = vmatprep.subr.mxu1 %v314_v1  ;;  %v118_v7 = vld [vmem:[%s418_s3 + $0x60] sm:$0xff]  ;;  %284 = vmatprep.mubr.msk.f32.mxu1 %vm315_vm0, %v314_v1  ;;  %v117_v8 = vld [vmem:[%s418_s3 + $0x58] sm:$0xff]  ;;  %vm200_vm2 = vcmask 261120  }
   0x7   :  { %257 = vmatpush3.msra.mxu1 %v119_v6  ;;  %v116_v9 = vld [vmem:[%s418_s3 + $0x50] sm:$0xff]  ;;  %v115_v10 = vld [vmem:[%s418_s3 + $0x48] sm:$0xff]  ;;  %v114_v11 = vld [vmem:[%s418_s3 + $0x40] sm:$0xff] }
   0x8   :  { %258 = vmatprep.subr.mxu1 %v314_v1  ;;  %v113_v12 = vld [vmem:[%s418_s3 + $0x38] sm:$0xff]  ;;  %v112_v13 = vld [vmem:[%s418_s3 + $0x30] sm:$0xff]  ;;  %v111_v14 = vld [vmem:[%s418_s3 + $0x28] sm:$0xff] }
   0x9   :  { %259 = vmatpush3.msra.mxu1 %v118_v7  ;;  %v110_v15 = vld [vmem:[%s418_s3 + $0x20] sm:$0xff]  ;;  %v109_v16 = vld [vmem:[%s418_s3 + $0x18] sm:$0xff]  ;;  %v108_v17 = vld [vmem:[%s418_s3 + $0x10] sm:$0xff] }
   0xa   :  { %260 = vmatprep.subr.mxu1 %v314_v1  ;;  %v107_v18 = vld [vmem:[%s418_s3 + $0x8] sm:$0xff]  ;;  %v106_v19 = vld [vmem:[%s418_s3] sm:$0xff] }
   0xb   :  { %261 = vmatpush3.msra.mxu1 %v117_v8  ;;  %v222_v20 = vld [vmem:[%s417_s2] ss:$0 sm:$0xff]  ;;  %s316_s2 = smov [#allocation2]  }
   0xc   :  { %262 = vmatprep.subr.mxu1 %v314_v1  ;;  %v224_v25 = vld [vmem:[%s419_s4] ss:$0 sm:$0xff]  ;;  %s214_s3 = sshll.u32 %s316_s2, 4  ;;  %s215_s3 = int_to_ptr.vmem [resolvable:$true] %s214_s3 }
   0xd   :  { %263 = vmatpush3.msra.mxu1 %v116_v9  ;;  %s292_s6 = scalar_lea.vmem %s215_s3, 128  ;;  %p297_p1 = scmp.lt.s32.totalorder %s215_s3, %s215_s3 }
   0xe   :  { %264 = vmatprep.subr.mxu1 %v314_v1  ;;  %p293_p0 = scmp.ne.s32.totalorder %s215_s3, %s292_s6  ;;  %p298_p2 = scmp.lt.s32.totalorder %s292_s6, %s292_s6 }
   0xf   :  { %265 = vmatpush3.msra.mxu1 %v115_v10 }
  0x10   :  { %266 = vmatprep.subr.mxu1 %v314_v1  ;;  %p299_p3 = por %p298_p2, %p297_p1 }
  0x11   :  { %267 = vmatpush3.msra.mxu1 %v114_v11 }
  0x12   :  { %268 = vmatprep.subr.mxu1 %v314_v1  ;;  %p300_p4 = pnand %p299_p3, %p293_p0 }
  0x13   :  { %269 = vmatpush3.msra.mxu1 %v113_v12 }
  0x14   :  { %270 = vmatprep.subr.mxu1 %v314_v1 }
  0x15   :  { %271 = vmatpush3.msra.mxu1 %v112_v13 }
  0x16   :  { %272 = vmatprep.subr.mxu1 %v314_v1 }
  0x17   :  { %273 = vmatpush3.msra.mxu1 %v111_v14 }
  0x18   :  { %274 = vmatprep.subr.mxu1 %v314_v1 }
  0x19   :  { %275 = vmatpush3.msra.mxu1 %v110_v15 }
  0x1a   :  { %276 = vmatprep.subr.mxu1 %v314_v1 }
  0x1b   :  { %277 = vmatpush3.msra.mxu1 %v109_v16 }
  0x1c   :  { %278 = vmatprep.subr.mxu1 %v314_v1 }
  0x1d   :  { %279 = vmatpush3.msra.mxu1 %v108_v17 }
  0x1e   :  { %280 = vmatprep.subr.mxu1 %v314_v1 }
  0x1f   :  { %281 = vmatpush3.msra.mxu1 %v107_v18 }
  0x20   :  { %282 = vmatprep.subr.mxu1 %v314_v1 }
  0x21   :  { %283 = vmatpush3.msra.mxu1 %v106_v19 }
  0xc5   :  { %v101_v21 = vpop.f32.mrf.mxu0 }
  0xc6   :  { %v102_v22 = vadd.f32 %v222_v20, %v101_v21 }
  0xc7   :  { %v251_v23 = vpop.f32.mrf.mxu0 }
  0xc8   :  { %v105_v24 = vmax.f32 %v102_v22, 0.0 }
  0xca   :  { %285 = vmatmul.mubr.f32.vlgmr.msra.gmra.mxu1 %v105_v24 }
 0x18a   :  { %v195_v26 = vpop.f32.mrf.mxu1 }
 0x18b   :  { %v196_v27 = vadd.f32 %v224_v25, %v195_v26 }
 0x18c   :  { %v286_v28 = vpop.f32.mrf.mxu1 }
 0x18d   :  { %v199_v29 = vmul.f32 %v196_v27, %v196_v27 }
 0x18f   :  { %v201_v30 = vsel %vm200_vm2, %v199_v29, 0.0 }
 0x190   :  { %202 = vadd.xlane.f32.xlu0 %v201_v30 }
 0x219   :  { %v203_v31 = vpop.xlane.xlu0 %202 }
 0x21a   :  { %v204_v32 = vmax.f32 %v203_v31, 1e-24 }
 0x21c   :  { %290 = vrsqrt.f32 %v204_v32 }
 0x229   :  { %v291_v33 = vpop.eup %290 }
 0x22a   :  { %v206_v34 = vmul.f32 %v291_v33, %v196_v27 }
 0x22c   :  { %207 = vst.msk [vmem:[#allocation2] sm:$0xff] %vm200_vm2, %v206_v34 }
 0x22d   :  { %303 = shalt.err (!%p300_p4)
}
 0x22e   :  { %217 = dma.vmem_to_hbm [thread:$0]  %s215_s3, 128, %s420_s5, [#allocation3]  }
 0x22f   :  { %312 = dma.done.wait [#allocation3], 128  }
 0x230   :  { %313 = vsyncadd [#allocation3], 4294967168 }
 0x231   :  { %221 = vsyncpa [#allocation3], 1 }

</bundles_post_ra>
